<compile_context>
chip_gen: v6e
topology: v6e:2x2x1
jax: 0.10.0
libtpu: 0.0.40
codegen_flags: <defaults>
</compile_context>

<pallas_src>
import functools

import jax
import jax.numpy as jnp
import numpy as np
from jax.experimental import pallas as pl
from jax.experimental.pallas import tpu as pltpu

LANE = 128


def _round_up(n, m):
    return ((n + m - 1) // m) * m


def extremal_mask_kernel(bidx_ref, x_ref, base_ref, mask_ref, wb_ref, bb_ref,
                         wf_ref, bf_ref, out_ref, acc_ref, *, inv_t):
    del bidx_ref  # consumed by the BlockSpec index_maps only
    t = pl.program_id(1)

    @pl.when(t == 0)
    def _():
        acc_ref[...] = jnp.zeros_like(acc_ref)

    x = x_ref[...]
    b = base_ref[...]
    m = jnp.clip(mask_ref[...], 0.0, 1.0)            # mask.clamp(0, 1)
    tb, tt, fp = x.shape

    # generated_baselines = model(x - baselines)  (per-timestep Linear(F, F))
    diff = (x - b).reshape(tb * tt, fp)
    gb = jnp.dot(diff, wb_ref[...], preferred_element_type=jnp.float32) + bb_ref[...]
    gb = gb.reshape(tb, tt, fp)

    # x1 = x * mask + generated_baselines * (1 - mask); accumulate sum over time.
    one_minus_m = 1.0 - m                             # hoisted, once per block
    x1 = x * m + gb * one_minus_m
    acc_ref[...] += jnp.sum(x1, axis=1)

    # Finalize: pooled = sum / T  (1/T folded into epilogue), logits = pooled @ Wf + bf
    @pl.when(t == pl.num_programs(1) - 1)
    def _():
        pooled = acc_ref[...] * inv_t
        logits = jnp.dot(pooled, wf_ref[...], preferred_element_type=jnp.float32) + bf_ref[...]
        out_ref[...] = logits.astype(out_ref.dtype)


def extremal_mask_forward(x, batch_idx, baselines, mask_param, wb, bb, wf, bf,
                          *, tt=None):
    """Pallas wrapper for ExtremalMaskNN.forward (batch_size == x.shape[0])."""
    B, T, F = x.shape
    N, T_mask, F_mask = mask_param.shape
    C = wf.shape[1]
    assert F_mask == F
    assert T_mask >= T, "mask time length must cover x (mask is truncated to x.shape[1])"
    assert N % B == 0, "mask rows must tile evenly by batch_size"
    assert (batch_idx + 1) * B <= N

    tt = T if tt is None else tt
    assert T % tt == 0 and tt % 8 == 0, "time tile must divide T and be a multiple of 8"
    tb = B                                            # small batches: one batch tile

    Fp = _round_up(F, LANE)
    Cp = _round_up(C, LANE)

    f32 = jnp.float32
    # Zero-pad to lane-dense shapes (numerically exact).
    x_p = jnp.pad(x.astype(f32), ((0, 0), (0, 0), (0, Fp - F)))
    base_p = jnp.pad(baselines.astype(f32), ((0, 0), (0, 0), (0, Fp - F)))
    mask_p = jnp.pad(mask_param.astype(f32), ((0, 0), (0, 0), (0, Fp - F)))
    wb_p = jnp.pad(wb.astype(f32), ((0, Fp - F), (0, Fp - F)))
    bb_p = jnp.pad(bb.astype(f32).reshape(1, F), ((0, 0), (0, Fp - F)))
    wf_p = jnp.pad(wf.astype(f32), ((0, Fp - F), (0, Cp - C)))
    bf_p = jnp.pad(bf.astype(f32).reshape(1, C), ((0, 0), (0, Cp - C)))

    bidx = jnp.asarray([batch_idx], dtype=jnp.int32)  # scalar-prefetched into SMEM
    blocks_per_call = B // tb                         # == 1 here; kept general

    grid_spec = pltpu.PrefetchScalarGridSpec(
        num_scalar_prefetch=1,
        grid=(B // tb, T // tt),
        in_specs=[
            pl.BlockSpec((tb, tt, Fp), lambda b, t, bi: (b, t, 0)),                          # x
            pl.BlockSpec((tb, tt, Fp), lambda b, t, bi: (b, t, 0)),                          # baselines
            pl.BlockSpec((tb, tt, Fp), lambda b, t, bi: (blocks_per_call * bi[0] + b, t, 0)),  # mask slice
            pl.BlockSpec((Fp, Fp), lambda b, t, bi: (0, 0)),                                 # Wb
            pl.BlockSpec((1, Fp), lambda b, t, bi: (0, 0)),                                  # bb
            pl.BlockSpec((Fp, Cp), lambda b, t, bi: (0, 0)),                                 # Wf
            pl.BlockSpec((1, Cp), lambda b, t, bi: (0, 0)),                                  # bf
        ],
        out_specs=pl.BlockSpec((tb, Cp), lambda b, t, bi: (b, 0)),
        scratch_shapes=[pltpu.VMEM((tb, Fp), jnp.float32)],
    )

    logits_p = pl.pallas_call(
        functools.partial(extremal_mask_kernel, inv_t=1.0 / float(T)),
        out_shape=jax.ShapeDtypeStruct((B, Cp), jnp.float32),
        grid_spec=grid_spec,
        compiler_params=pltpu.CompilerParams(
            dimension_semantics=("parallel", "arbitrary"),
            vmem_limit_bytes=64 << 20,
        ),
    )(bidx, x_p, base_p, mask_p, wb_p, bb_p, wf_p, bf_p)

    logits = logits_p[:, :C]
    # Module returns (_run_forward(...), _run_forward(...)) -- identical tensors.
    return logits, logits


def reference_forward(x, batch_idx, baselines, mask_param, wb, bb, wf, bf):
    """Pure-JAX reference of the PyTorch forward semantics."""
    B, T, F = x.shape
    m = jax.lax.dynamic_slice_in_dim(mask_param, B * batch_idx, B, axis=0)
    m = jnp.clip(m, 0.0, 1.0)
    gb = (x - baselines).reshape(B * T, F) @ wb + bb
    gb = gb.reshape(B, T, F)
    m = m[:, :T, ...]
    x1 = x * m + gb * (1.0 - m)
    logits = jnp.mean(x1, axis=1) @ wf + bf
    return logits, logits


if __name__ == "__main__":
    # Small deterministic shapes: dataset N=8, batch B=4, seq T=16, feat F=32, classes C=8.
    N, B, T, F, C = 8, 4, 16, 32, 8
    batch_idx = 1

    key = jax.random.PRNGKey(0)
    kx, kb, kwb, kbb, kwf, kbf = jax.random.split(key, 6)

    x = jax.random.normal(kx, (B, T, F), dtype=jnp.float32)
    baselines = jax.random.normal(kb, (B, T, F), dtype=jnp.float32)

    # nn.Parameter mask; reset_parameters() fills with 0.5 (use varied values for a stronger test).
    mask_param = jax.random.uniform(jax.random.PRNGKey(1), (N, T, F), dtype=jnp.float32,
                                    minval=-0.2, maxval=1.2)

    # Deterministic synthetic weights for `model` and `forward_func`.
    wb = jax.random.normal(kwb, (F, F), dtype=jnp.float32) * 0.1
    bb = jax.random.normal(kbb, (F,), dtype=jnp.float32) * 0.1
    wf = jax.random.normal(kwf, (F, C), dtype=jnp.float32) * 0.1
    bf = jax.random.normal(kbf, (C,), dtype=jnp.float32) * 0.1

    out1, out2 = extremal_mask_forward(x, batch_idx, baselines, mask_param, wb, bb, wf, bf, tt=8)
    jax.block_until_ready((out1, out2))

    ref1, ref2 = reference_forward(x, batch_idx, baselines, mask_param, wb, bb, wf, bf)
    np.testing.assert_allclose(np.asarray(out1), np.asarray(ref1), rtol=1e-5, atol=1e-5)
    np.testing.assert_allclose(np.asarray(out2), np.asarray(ref2), rtol=1e-5, atol=1e-5)

    print("KERNEL_OK")
</pallas_src>

<mosaic_0001>
module attributes {stable_mosaic.version = 11 : i64} {
  func.func @extremal_mask_kernel(%arg0: i32, %arg1: i32, %arg2: memref<1xi32, #tpu.memory_space<smem>>, %arg3: memref<4x8x128xf32, #tpu.memory_space<vmem>>, %arg4: memref<4x8x128xf32, #tpu.memory_space<vmem>>, %arg5: memref<4x8x128xf32, #tpu.memory_space<vmem>>, %arg6: memref<128x128xf32, #tpu.memory_space<vmem>>, %arg7: memref<1x128xf32, #tpu.memory_space<vmem>>, %arg8: memref<128x128xf32, #tpu.memory_space<vmem>>, %arg9: memref<1x128xf32, #tpu.memory_space<vmem>>, %arg10: memref<4x128xf32, #tpu.memory_space<vmem>>, %arg11: memref<4x128xf32, #tpu.memory_space<vmem>>) attributes {dimension_semantics = [#tpu.dimension_semantics<parallel>, #tpu.dimension_semantics<arbitrary>], iteration_bounds = array<i64: 1, 2>, scalar_prefetch = 1 : i64, scratch_operands = 1 : i64, tpu.core_type = #tpu.core_type<tc>, window_params = [{transform_indices = @transform_0, window_bounds = array<i64: 4, 8, 128>}, {transform_indices = @transform_1, window_bounds = array<i64: 4, 8, 128>}, {transform_indices = @transform_2, window_bounds = array<i64: 4, 8, 128>}, {pipeline_mode = #tpu.pipeline_mode<synchronous>, transform_indices = @transform_3, window_bounds = array<i64: 128, 128>}, {pipeline_mode = #tpu.pipeline_mode<synchronous>, transform_indices = @transform_4, window_bounds = array<i64: 1, 128>}, {pipeline_mode = #tpu.pipeline_mode<synchronous>, transform_indices = @transform_5, window_bounds = array<i64: 128, 128>}, {pipeline_mode = #tpu.pipeline_mode<synchronous>, transform_indices = @transform_6, window_bounds = array<i64: 1, 128>}, {transform_indices = @transform_7, window_bounds = array<i64: 4, 128>}]} {
    %c0_i32 = arith.constant 0 : i32
    %0 = arith.cmpi eq, %arg1, %c0_i32 : i32
    %1 = arith.extui %0 : i1 to i32
    %c0_i32_0 = arith.constant 0 : i32
    %2 = arith.cmpi ne, %1, %c0_i32_0 : i32
    scf.if %2 {
      %cst_22 = arith.constant 0.000000e+00 : f32
      %30 = vector.broadcast %cst_22 : f32 to vector<4x128xf32>
      %c0_23 = arith.constant 0 : index
      %c0_24 = arith.constant 0 : index
      %31 = vector.load %arg11[%c0_23, %c0_24] : memref<4x128xf32, #tpu.memory_space<vmem>>, vector<4x128xf32>
      tpu.vector_store %arg11[%c0_23, %c0_24], %30 {strides = array<i32>} : memref<4x128xf32, #tpu.memory_space<vmem>>, vector<4x128xf32>,
    } else {
    }
    %c0 = arith.constant 0 : index
    %c0_1 = arith.constant 0 : index
    %c0_2 = arith.constant 0 : index
    %3 = vector.load %arg3[%c0, %c0_1, %c0_2] : memref<4x8x128xf32, #tpu.memory_space<vmem>>, vector<4x8x128xf32>
    %c0_3 = arith.constant 0 : index
    %c0_4 = arith.constant 0 : index
    %c0_5 = arith.constant 0 : index
    %4 = vector.load %arg4[%c0_3, %c0_4, %c0_5] : memref<4x8x128xf32, #tpu.memory_space<vmem>>, vector<4x8x128xf32>
    %c0_6 = arith.constant 0 : index
    %c0_7 = arith.constant 0 : index
    %c0_8 = arith.constant 0 : index
    %5 = vector.load %arg5[%c0_6, %c0_7, %c0_8] : memref<4x8x128xf32, #tpu.memory_space<vmem>>, vector<4x8x128xf32>
    %cst = arith.constant 0.000000e+00 : f32
    %cst_9 = arith.constant 1.000000e+00 : f32
    %6 = vector.broadcast %cst : f32 to vector<4x8x128xf32>
    %7 = arith.maximumf %6, %5 : vector<4x8x128xf32>
    %8 = vector.broadcast %cst_9 : f32 to vector<4x8x128xf32>
    %9 = arith.minimumf %8, %7 : vector<4x8x128xf32>
    %10 = arith.subf %3, %4 : vector<4x8x128xf32>
    %11 = vector.shape_cast %10 : vector<4x8x128xf32> to vector<32x128xf32>
    %c0_10 = arith.constant 0 : index
    %c0_11 = arith.constant 0 : index
    %12 = vector.load %arg6[%c0_10, %c0_11] : memref<128x128xf32, #tpu.memory_space<vmem>>, vector<128x128xf32>
    %cst_12 = arith.constant dense<0.000000e+00> : vector<32x128xf32>
    %13 = tpu.matmul %11, %12, %cst_12 {dimension_numbers = #tpu.dot_dimension_numbers<[1], [0], [0], [1], [0, 0, 1, 1], [], []>} : vector<32x128xf32>, vector<128x128xf32>, vector<32x128xf32> -> vector<32x128xf32>
    %c0_13 = arith.constant 0 : index
    %c0_14 = arith.constant 0 : index
    %14 = vector.load %arg7[%c0_13, %c0_14] : memref<1x128xf32, #tpu.memory_space<vmem>>, vector<1x128xf32>
    %15 = vector.broadcast %14 : vector<1x128xf32> to vector<32x128xf32>
    %16 = arith.addf %13, %15 : vector<32x128xf32>
    %17 = vector.shape_cast %16 : vector<32x128xf32> to vector<4x8x128xf32>
    %cst_15 = arith.constant 1.000000e+00 : f32
    %18 = vector.broadcast %cst_15 : f32 to vector<4x8x128xf32>
    %19 = arith.subf %18, %9 : vector<4x8x128xf32>
    %20 = arith.mulf %3, %9 : vector<4x8x128xf32>
    %21 = arith.mulf %17, %19 : vector<4x8x128xf32>
    %22 = arith.addf %20, %21 : vector<4x8x128xf32>
    %c0_16 = arith.constant 0 : index
    %c0_17 = arith.constant 0 : index
    %23 = vector.load %arg11[%c0_16, %c0_17] : memref<4x128xf32, #tpu.memory_space<vmem>>, vector<4x128xf32>
    %cst_18 = arith.constant dense<0.000000e+00> : vector<4x128xf32>
    %24 = vector.multi_reduction <add>, %22, %cst_18 [1] : vector<4x8x128xf32> to vector<4x128xf32>
    %25 = arith.addf %23, %24 : vector<4x128xf32>
    %c0_19 = arith.constant 0 : index
    %c0_20 = arith.constant 0 : index
    %26 = vector.load %arg11[%c0_19, %c0_20] : memref<4x128xf32, #tpu.memory_space<vmem>>, vector<4x128xf32>
    tpu.vector_store %arg11[%c0_19, %c0_20], %25 {strides = array<i32>} : memref<4x128xf32, #tpu.memory_space<vmem>>, vector<4x128xf32>,
    %c1_i32 = arith.constant 1 : i32
    %27 = arith.cmpi eq, %arg1, %c1_i32 : i32
    %28 = arith.extui %27 : i1 to i32
    %c0_i32_21 = arith.constant 0 : i32
    %29 = arith.cmpi ne, %28, %c0_i32_21 : i32
    scf.if %29 {
      %c0_22 = arith.constant 0 : index
      %c0_23 = arith.constant 0 : index
      %30 = vector.load %arg11[%c0_22, %c0_23] : memref<4x128xf32, #tpu.memory_space<vmem>>, vector<4x128xf32>
      %cst_24 = arith.constant 6.250000e-02 : f32
      %31 = vector.broadcast %cst_24 : f32 to vector<4x128xf32>
      %32 = arith.mulf %30, %31 : vector<4x128xf32>
      %c0_25 = arith.constant 0 : index
      %c0_26 = arith.constant 0 : index
      %33 = vector.load %arg8[%c0_25, %c0_26] : memref<128x128xf32, #tpu.memory_space<vmem>>, vector<128x128xf32>
      %cst_27 = arith.constant dense<0.000000e+00> : vector<4x128xf32>
      %34 = tpu.matmul %32, %33, %cst_27 {dimension_numbers = #tpu.dot_dimension_numbers<[1], [0], [0], [1], [0, 0, 1, 1], [], []>} : vector<4x128xf32>, vector<128x128xf32>, vector<4x128xf32> -> vector<4x128xf32>
      %c0_28 = arith.constant 0 : index
      %c0_29 = arith.constant 0 : index
      %35 = vector.load %arg9[%c0_28, %c0_29] : memref<1x128xf32, #tpu.memory_space<vmem>>, vector<1x128xf32>
      %36 = vector.broadcast %35 : vector<1x128xf32> to vector<4x128xf32>
      %37 = arith.addf %34, %36 : vector<4x128xf32>
      %c0_30 = arith.constant 0 : index
      %c0_31 = arith.constant 0 : index
      %38 = vector.load %arg10[%c0_30, %c0_31] : memref<4x128xf32, #tpu.memory_space<vmem>>, vector<4x128xf32>
      tpu.vector_store %arg10[%c0_30, %c0_31], %37 {strides = array<i32>} : memref<4x128xf32, #tpu.memory_space<vmem>>, vector<4x128xf32>,
    } else {
    }
    return
  }
  func.func @transform_0(%arg0: i32, %arg1: i32, %arg2: memref<1xi32, #tpu.memory_space<smem>>) -> (i32, i32, i32) {
    %c0_i32 = arith.constant 0 : i32
    %c0_i32_0 = arith.constant 0 : i32
    return %arg0, %arg1, %c0_i32 : i32, i32, i32
  }
  func.func @transform_1(%arg0: i32, %arg1: i32, %arg2: memref<1xi32, #tpu.memory_space<smem>>) -> (i32, i32, i32) {
    %c0_i32 = arith.constant 0 : i32
    %c0_i32_0 = arith.constant 0 : i32
    return %arg0, %arg1, %c0_i32 : i32, i32, i32
  }
  func.func @transform_2(%arg0: i32, %arg1: i32, %arg2: memref<1xi32, #tpu.memory_space<smem>>) -> (i32, i32, i32) {
    %c0 = arith.constant 0 : index
    %0 = memref.load %arg2[%c0] : memref<1xi32, #tpu.memory_space<smem>>
    %c1_i32 = arith.constant 1 : i32
    %1 = arith.muli %c1_i32, %0 : i32
    %2 = arith.addi %1, %arg0 : i32
    %c0_i32 = arith.constant 0 : i32
    %c0_i32_0 = arith.constant 0 : i32
    return %2, %arg1, %c0_i32 : i32, i32, i32
  }
  func.func @transform_3(%arg0: i32, %arg1: i32, %arg2: memref<1xi32, #tpu.memory_space<smem>>) -> (i32, i32) {
    %c0_i32 = arith.constant 0 : i32
    %c0_i32_0 = arith.constant 0 : i32
    %c0_i32_1 = arith.constant 0 : i32
    return %c0_i32, %c0_i32_0 : i32, i32
  }
  func.func @transform_4(%arg0: i32, %arg1: i32, %arg2: memref<1xi32, #tpu.memory_space<smem>>) -> (i32, i32) {
    %c0_i32 = arith.constant 0 : i32
    %c0_i32_0 = arith.constant 0 : i32
    %c0_i32_1 = arith.constant 0 : i32
    return %c0_i32, %c0_i32_0 : i32, i32
  }
  func.func @transform_5(%arg0: i32, %arg1: i32, %arg2: memref<1xi32, #tpu.memory_space<smem>>) -> (i32, i32) {
    %c0_i32 = arith.constant 0 : i32
    %c0_i32_0 = arith.constant 0 : i32
    %c0_i32_1 = arith.constant 0 : i32
    return %c0_i32, %c0_i32_0 : i32, i32
  }
  func.func @transform_6(%arg0: i32, %arg1: i32, %arg2: memref<1xi32, #tpu.memory_space<smem>>) -> (i32, i32) {
    %c0_i32 = arith.constant 0 : i32
    %c0_i32_0 = arith.constant 0 : i32
    %c0_i32_1 = arith.constant 0 : i32
    return %c0_i32, %c0_i32_0 : i32, i32
  }
  func.func @transform_7(%arg0: i32, %arg1: i32, %arg2: memref<1xi32, #tpu.memory_space<smem>>) -> (i32, i32) {
    %c0_i32 = arith.constant 0 : i32
    %c0_i32_0 = arith.constant 0 : i32
    return %arg0, %c0_i32 : i32, i32
  }
}

</mosaic_0001>

<bundles_post_ra>
// kernel: tpu_custom_call.1
= control target key start
LH: loop header
LB: loop body
LE: loop exit
PB: predicated region body
PF: predicated region fallthrough
CT: control target
= control target key end

     0   :  { %s1764_s0 = inlined_call_operand.<no memory space> [shape: s32[1], index: 0, kind: input, shape index: {}]   ;;  %s1765_s1 = inlined_call_operand.hbm [shape: f32[4,16,128], index: 1, kind: input, shape index: {}]   ;;  %s1766_s2 = inlined_call_operand.hbm [shape: f32[4,16,128], index: 2, kind: input, shape index: {}]   ;;  %s1767_s3 = inlined_call_operand.hbm [shape: f32[8,16,128], index: 3, kind: input, shape index: {}]   ;;  %s1768_s4 = inlined_call_operand.hbm [shape: f32[128,128], index: 4, kind: input, shape index: {}]   ;;  %s1769_s5 = inlined_call_operand.vmem [shape: f32[1,128], index: 5, kind: input, shape index: {}]   ;;  %s1770_s6 = inlined_call_operand.hbm [shape: f32[128,128], index: 6, kind: input, shape index: {}]   ;;  %s1771_s7 = inlined_call_operand.vmem [shape: f32[1,128], index: 7, kind: input, shape index: {}]   ;;  %s1772_s8 = inlined_call_operand.hbm [shape: f32[4,128], index: 8, kind: output, shape index: {}]  }
   0x1   :  { %1790 = sst [smem:[#allocation26_spill]] %s1766_s2 }
   0x2   :  { %1791 = sst [smem:[#allocation27_spill]] %s1768_s4 }
   0x3   :  { %1792 = sst [smem:[#allocation28_spill]] %s1769_s5 }
   0x4   :  { %1793 = sst [smem:[#allocation29_spill]] %s1771_s7 }
   0x5   :  { %1794 = sst [smem:[#allocation30_spill]] %s1772_s8 }
   0x6   :  { %13 = sst [smem:[#allocation4]] %s1764_s0 }
   0x7   :  { %14 = vsyncpa [#allocation6], 0 }
   0x8   :  { %16 = vsyncpa [#allocation6 + $0x1], 0 }
   0x9   :  { %17 = vsyncpa [#allocation9], 0 }
   0xa   :  { %19 = vsyncpa [#allocation9 + $0x1], 0 }
   0xb   :  { %20 = vsyncpa [#allocation12], 0 }
   0xc   :  { %21 = vsyncpa [#allocation7], 0  ;;  %s1468_s29 = smov 0   ;;  %s1470_s30 = smov 0  }
   0xd   :  { %s1472_s9 = smov 0   ;;  %s1474_s10 = smov 0  }
   0xe   :  { %s1476_s11 = smov 0   ;;  %s1478_s12 = smov 0  }
   0xf   :  { %s1480_s13 = smov 0   ;;  %s1482_s0 = smov 0  }
  0x10   :  { %s1484_s14 = smov 0  }
  0x11 LB: > { %1795 = sst [smem:[#allocation20_spill]] %s1398_s13  ;;  %s1510_s15 = sadd.s32 4294967295, %s1406_s14   ;;  %s1406_s14 = sphi %s1484_s14, %s27_s14   ;;  %s1402_s0 = sphi %s1482_s0, %s1838_s0   ;;  %s1398_s13 = sphi %s1480_s13, %s1837_s13   ;;  %s1394_s12 = sphi %s1478_s12, %s1836_s12   ;;  %s1390_s11 = sphi %s1476_s11, %s1835_s11   ;;  %s1386_s10 = sphi %s1474_s10, %s1834_s10   ;;  %s1382_s9 = sphi %s1472_s9, %s1833_s9   ;;  %s1378_s30 = sphi %s1470_s30, %s1832_s30   ;;  %s1374_s29 = sphi %s1468_s29, %s1831_s29  }
  0x12   : > { %1796 = sst [smem:[#allocation21_spill]] %s1406_s14  ;;  %p1773_p0 = scmp.eq.s32.totalorder %s1406_s14, 0 }
  0x13   : > { %p61_p1 = scmp.ne.s32.totalorder %s1390_s11, %s1386_s10  ;;  %p1774_p2 = scmp.eq.s32.totalorder %s1510_s15, 0 }
  0x14   : > { %p115_p3 = scmp.ne.s32.totalorder %s1382_s9, %s1378_s30  ;;  %p121_p5 = scmp.ne.s32.totalorder %s1378_s30, %s1374_s29 }
  0x15   : > { %p1520_p4 = por %p1774_p2, %p61_p1  ;;  %p864_p7 = scmp.ge.s32.totalorder %s1406_s14, 1 }
  0x16   : > { %p117_p6 = por %p115_p3, %p1773_p0  ;;  %p1530_p8 = por %p121_p5, %p1774_p2 }
  0x17   : > { %s1797_s17 = scalar_select %p1520_p4, 1, 0 }
  0x18   : > { %s1798_s18 = scalar_select %p1530_p8, 1, 0 }
  0x19   : > { %p242_p9 = scmp.lt.s32.totalorder %s1406_s14, 3  ;;  %s1408_s20 = smov [#allocation11]  }
  0x1a   : > { %1799 = sst [smem:[#allocation22_spill]] %s1798_s18  ;;  %s254_s21 = sshll.u32 %s1408_s20, 4  ;;  %s255_s21 = int_to_ptr.vmem [resolvable:$true] %s254_s21 }
  0x1b   : > { %p1535_p10 = pnand %p864_p7, %p242_p9  ;;  %p1070_p12 = scmp.lt.s32.totalorder %s1406_s14, 2 }
  0x1c   : > { %s1167_s24 = scalar_lea.vmem %s255_s21, 2048  ;;  %p1175_p0 = scmp.lt.s32.totalorder %s255_s21, %s255_s21 }
  0x1d   : > { %s1800_s19 = scalar_select %p1535_p10, 1, 0 }
  0x1e   : > { %p1051_p11 = pneg %p1535_p10  ;;  %p1550_p1 = pnand %p1070_p12, %p117_p6 }
  0x1f   : > { %p1168_p5 = scmp.ne.s32.totalorder %s255_s21, %s1167_s24 }
  0x20   : > { %p1544_p13 = pnand %p1051_p11, %p1774_p2  ;;  %p1176_p11 = scmp.lt.s32.totalorder %s1167_s24, %s1167_s24 }
  0x22   : > { %p1158_p3 = pneg %p1544_p13  ;;  %p1177_p2 = por %p1176_p11, %p1175_p0 }
  0x24   : > { %p1170_p7 = pnand %p1168_p5, %p1158_p3 }
  0x26   : > { %p1171_p9 = pneg %p1170_p7 }
  0x28   : > { %p1178_p8 = pnand %p1177_p2, %p1171_p9 }
  0x2a   : > { %1181 = shalt.err (!%p1178_p8)
}
  0x2b   : > { %s1776_s25 = smov 128   ;;  %s1778_s26 = smov 8  }
  0x2c   : > { %s1803_s4 = sld [smem:[#allocation27_spill]]  ;;  %s36_s29 = sadd.s32 1, %s1402_s0 }
  0x2d   : > { %s48_s10 = sadd.s32 1, %s1394_s12  ;;  %p37_p0 = scmp.ge.s32.totalorder %s36_s29, 2 }
  0x2e   : > { %p55_p2 = scmp.ne.s32.totalorder %s1394_s12, %s1390_s11  ;;  %s1571_s20 = sld [smem:[#allocation4]] }
  0x2f   : > { %s1780_s24 = sand.u32 1, %s1394_s12   ;;  %s1840_s29 = smov (%p37_p0, %s36_s29), 0 }
  0x30   : > { %1804 = sst [smem:[#allocation23_spill]] %s1840_s29  ;;  %p1805_p6 = scmp.eq.s32.totalorder %s1406_s14, 0 }
  0x31   : > { %s1580_s16 = sshll.u32 %s1780_s24, 5  ;;  %s1784_s27 = sshll.u32 %s1402_s0, 7 }
  0x32   : > { %1054 = dma.hbm_to_vmem [thread:$0]  (!%p1544_p13), %s1803_s4, 2048, %s255_s21, [#allocation12], %s1776_s25, %s1776_s25, %s1778_s26  }
  0x33   : > { %p57_p8 = por %p1805_p6, %p55_p2  ;;  %s44_s21 = ssub.s32 %s1402_s0, %s1840_s29 }
  0x34   : > { %p46_p5 = scmp.eq.s32.totalorder %s44_s21, 0  ;;  %s310_s25 = sand.u32 1, %s1406_s14  }
  0x35   : > { %p1587_p7 = pnand %p1070_p12, %p57_p8  ;;  %s1808_s2 = sld [smem:[#allocation26_spill]] }
  0x36   : > { %s1593_s26 = scalar_select %p46_p5, %s1394_s12, %s48_s10  }
  0x37   : > { %s314_s7 = scalar_lea.vmem [#allocation8], %s1580_s16  ;;  %s1809_s29 = sadd.s32 1, %s1382_s9 }
  0x38   : > { %1807 = sst [smem:[#allocation24_spill]] %s1593_s26  ;;  %s323_s5 = sshll.u32 %s314_s7, 4  ;;  %s324_s5 = int_to_ptr.vmem [resolvable:$true] %s323_s5 }
  0x39   : > { %s1604_s13 = scalar_select %p46_p5, %s1382_s9, %s1809_s29  }
  0x3a   : > { %s1606_s21 = scalar_lea.sflag [#allocation9], %s310_s25  ;;  %p1184_p12 = pneg %p1587_p7 }
  0x3b   : > { %s322_s24 = scalar_lea.hbm %s1808_s2, %s1784_s27  ;;  %1810 = sst [smem:[#allocation25_spill]] %s1604_s13 }
  0x3c   : > { %s1195_s18 = scalar_lea.vmem %s324_s5, 512  ;;  %s1411_s10 = smov [#allocation8]  }
  0x3d   : > { %p1196_p9 = scmp.ne.s32.totalorder %s324_s5, %s1195_s18  ;;  %s1200_s26 = sshll.u32 %s1411_s10, 4  ;;  %s1201_s26 = int_to_ptr.vmem [resolvable:$false] %s1200_s26 }
  0x3e   : > { %s1202_s4 = scalar_lea.vmem %s1201_s26, 1024  ;;  %p1203_p2 = scmp.lt.s32.totalorder %s324_s5, %s1201_s26 }
  0x3f   : > { %p1198_p11 = pnand %p1196_p9, %p1184_p12  ;;  %p1204_p6 = scmp.lt.s32.totalorder %s1202_s4, %s1195_s18 }
  0x41   : > { %p1199_p0 = pneg %p1198_p11  ;;  %p1205_p8 = por %p1204_p6, %p1203_p2 }
  0x43   : > { %p1206_p5 = pnand %p1205_p8, %p1199_p0 }
  0x45   : > { %1209 = shalt.err (!%p1206_p5)
}
  0x46   : > { %s1785_s7 = smov 256   ;;  %s1811_s8 = smov 8  }
  0x47   : > { %s1812_s25 = smov 128   ;;  %s1413_s29 = smov [#allocation13]  }
  0x48   : > { %1064 = dma.hbm_to_vmem [thread:$0]  (!%p1587_p7), %s322_s24, 512, %s324_s5, %s1606_s21, %s1785_s7, %s1812_s25, %s1811_s8  }
  0x49   : > { %s270_s27 = sshll.u32 %s1413_s29, 4  ;;  %s271_s27 = int_to_ptr.vmem [resolvable:$true] %s270_s27 }
  0x4a   : > { %s1221_s10 = scalar_lea.vmem %s271_s27, 2048  ;;  %p1229_p0 = scmp.lt.s32.totalorder %s271_s27, %s271_s27 }
  0x4b   : > { %p1222_p9 = scmp.ne.s32.totalorder %s271_s27, %s1221_s10  ;;  %p1230_p6 = scmp.lt.s32.totalorder %s1221_s10, %s1221_s10 }
  0x4d   : > { %p1224_p11 = pnand %p1222_p9, %p1158_p3  ;;  %p1231_p8 = por %p1230_p6, %p1229_p0 }
  0x4f   : > { %p1225_p2 = pneg %p1224_p11 }
  0x51   : > { %p1232_p5 = pnand %p1231_p8, %p1225_p2 }
  0x53   : > { %1235 = shalt.err (!%p1232_p5)
}
  0x54   : > { %1057 = dma.hbm_to_vmem [thread:$0]  (!%p1544_p13), %s1770_s6, 2048, %s271_s27, [#allocation12], %s1812_s25, %s1812_s25, %s1811_s8  }
  0x55   : > { %s1813_s26 = sshll.u32 %s1402_s0, 7  ;;  %s291_s10 = scalar_lea.vmem [#allocation5], %s1580_s16 }
  0x56   : > { %s299_s29 = scalar_lea.hbm %s1765_s1, %s1813_s26  ;;  %s300_s7 = sshll.u32 %s291_s10, 4  ;;  %s301_s7 = int_to_ptr.vmem [resolvable:$true] %s300_s7 }
  0x57   : > { %s335_s22 = sand.u32 1, %s1382_s9   ;;  %s1814_s2 = sand.u32 1, %s1394_s12  }
  0x58   : > { %s288_s13 = scalar_lea.sflag [#allocation6], %s1814_s2  ;;  %s1249_s14 = scalar_lea.vmem %s301_s7, 512 }
  0x59   : > { %p1250_p3 = scmp.ne.s32.totalorder %s301_s7, %s1249_s14  ;;  %s1414_s5 = smov [#allocation5]  }
  0x5a   : > { %s1254_s18 = sshll.u32 %s1414_s5, 4  ;;  %s1255_s18 = int_to_ptr.vmem [resolvable:$false] %s1254_s18 }
  0x5b   : > { %p1252_p9 = pnand %p1250_p3, %p1184_p12  ;;  %s1256_s27 = scalar_lea.vmem %s1255_s18, 1024 }
  0x5c   : > { %p1257_p13 = scmp.lt.s32.totalorder %s301_s7, %s1255_s18  ;;  %p1258_p2 = scmp.lt.s32.totalorder %s1256_s27, %s1249_s14 }
  0x5d   : > { %p1253_p11 = pneg %p1252_p9 }
  0x5e   : > { %p1259_p0 = por %p1258_p2, %p1257_p13 }
  0x60   : > { %p1260_p6 = pnand %p1259_p0, %p1253_p11 }
  0x62   : > { %1263 = shalt.err (!%p1260_p6)
}
  0x63   : > { %s1815_s2 = smov 256   ;;  %s872_s16 = sshll.u32 %s335_s22, 5 }
  0x64   : > { %1061 = dma.hbm_to_vmem [thread:$0]  (!%p1587_p7), %s299_s29, 512, %s301_s7, %s288_s13, %s1815_s2, %s1812_s25, %s1811_s8  }
  0x65   : > { %s890_s26 = sshll.u32 %s1571_s20, 3  ;;  %s337_s10 = scalar_lea.vmem [#allocation10], %s872_s16 }
  0x66   : > { %s345_s24 = sadd.s32 %s1402_s0, %s890_s26  ;;  %s348_s5 = sshll.u32 %s337_s10, 4  ;;  %s1654_s5 = int_to_ptr.vmem [resolvable:$true] %s348_s5 }
  0x67   : > { %s875_s4 = sshll.u32 %s345_s24, 7  ;;  %p1266_p7 = pneg %p1550_p1 }
  0x68   : > { %s1652_s27 = scalar_lea.hbm %s1767_s3, %s875_s4  ;;  %s1269_s7 = scalar_lea.hbm %s1767_s3, 2048 }
  0x69   : > { %s1264_s28 = scalar_lea.hbm %s1652_s27, 512  ;;  %p1270_p3 = scmp.lt.s32.totalorder %s1652_s27, %s1767_s3 }
  0x6a   : > { %p1265_p12 = scmp.ne.s32.totalorder %s1652_s27, %s1264_s28  ;;  %p1271_p9 = scmp.lt.s32.totalorder %s1269_s7, %s1264_s28 }
  0x6c   : > { %p1267_p8 = pnand %p1266_p7, %p1265_p12  ;;  %p1272_p11 = por %p1271_p9, %p1270_p3 }
  0x6e   : > { %p1268_p5 = pneg %p1267_p8 }
  0x70   : > { %p1273_p13 = pnand %p1272_p11, %p1268_p5 }
  0x72   : > { %1276 = shalt.err (!%p1273_p13)
}
  0x73   : > { %s1277_s16 = scalar_lea.vmem %s1654_s5, 512  ;;  %s1415_s26 = smov [#allocation10]  }
  0x74   : > { %p1278_p2 = scmp.ne.s32.totalorder %s1654_s5, %s1277_s16  ;;  %s1282_s24 = sshll.u32 %s1415_s26, 4  ;;  %s1283_s24 = int_to_ptr.vmem [resolvable:$false] %s1282_s24 }
  0x75   : > { %s1284_s4 = scalar_lea.vmem %s1283_s24, 1024  ;;  %p1285_p12 = scmp.lt.s32.totalorder %s1654_s5, %s1283_s24 }
  0x76   : > { %p1280_p0 = pnand %p1278_p2, %p1266_p7  ;;  %p1286_p8 = scmp.lt.s32.totalorder %s1284_s4, %s1277_s16 }
  0x78   : > { %p1281_p6 = pneg %p1280_p0  ;;  %p1287_p4 = por %p1286_p8, %p1285_p12 }
  0x7a   : > { %p1288_p10 = pnand %p1287_p4, %p1281_p6 }
  0x7c   : > { %1291 = shalt.err (!%p1288_p10)
}
  0x7d   : > { %1067 = dma.hbm_to_vmem [thread:$0]  (!%p1550_p1), %s1652_s27, 512, %s1654_s5, %s1606_s21, %s1815_s2, %s1812_s25, %s1811_s8  }
  0x7e   : > { %p1816_p7 = scmp.ne.s32.totalorder %s1800_s19, 0 }
  0x7f   : > { %s362_s10 = sand.u32 (!%p1816_p7), 1, %s1390_s11   ;;  %p1817_p4 = scmp.ne.s32.totalorder (!%p1816_p7), %s1797_s17, 0 }
  0x80   : > { %360 = sbr.rel (%p1816_p7) target bundleno = 667 (0x29b), region = 48  ;;  %s877_s18 = sshll.u32 (!%p1816_p7), %s362_s10, 5 }
  0x81   : > { %s363_s14 = scalar_lea.sflag (!%p1816_p7), [#allocation6], %s362_s10  ;;  %s1681_s28 = scalar_lea.vmem (!%p1816_p7), [#allocation5], %s877_s18 }
  0x85   : > { %1353 = dma.done.wait (%p1817_p4), %s363_s14, 512  }
  0x86   : > { %1355 = vsyncadd (%p1817_p4), %s363_s14, 4294966784  ;;  %s371_s23 = sand.u32 1, %s1510_s15   ;;  %s1688_s21 = scalar_lea.vmem [#allocation8], %s877_s18 }
  0x87   : > { %s372_s13 = scalar_lea.sflag [#allocation9], %s371_s23 }
  0x88   : > { %1357 = dma.done.wait (%p1817_p4), %s372_s13, 512  }
  0x89   : > { %1359 = vsyncadd (%p1817_p4), %s372_s13, 4294966784  ;;  %s1818_s19 = sld [smem:[#allocation22_spill]]  ;;  %s382_s8 = sand.u32 1, %s1378_s30  }
  0x8a   : > { %s879_s25 = sshll.u32 %s382_s8, 5 }
  0x8b   : > { %s1695_s2 = scalar_lea.vmem [#allocation10], %s879_s25 }
  0x8f   : > { %p1819_p10 = scmp.ne.s32.totalorder %s1818_s19, 0 }
  0x91   : > { %1361 = dma.done.wait (%p1819_p10), %s372_s13, 512  }
  0x92   : > { %1363 = vsyncadd (%p1819_p10), %s372_s13, 4294966784  ;;  %p1820_p1 = scmp.eq.s32.totalorder %s1510_s15, 0 }
  0x94   : > { %1365 = dma.done.wait (%p1820_p1), [#allocation12], 4096   ;;  %p1821_p5 = pmov %p1820_p1 }
  0x95   : > { %s1822_s5 = sld [smem:[#allocation20_spill]] }
  0x96   : > { %1367 = vsyncadd (%p1821_p5), [#allocation12], 4294963200 }
  0x9b   : > { %p882_p3 = scmp.ne.s32.totalorder %s1822_s5, 0 }
  0x9d   : > { %436 = sbr.rel (%p882_p3) target bundleno = 164 (0xa4), region = 72 }
  0xa2   : > { %v1416_v0 = vmov 0.0  }
  0xa3   : > { %437 = vst [vmem:[#allocation2] sm:$0xf] %v1416_v0 }
  0xa4 PF: > { %v477_v1 = vld [vmem:[#allocation11 + $0x78] sm:$0xff]  ;;  %v476_v2 = vld [vmem:[#allocation11 + $0x70] sm:$0xff]  ;;  %v475_v3 = vld [vmem:[#allocation11 + $0x68] sm:$0xff]  ;;  %s1823_s20 = sld [smem:[#allocation28_spill]]  ;;  %vm615_vm0 = vcmask 1041409   ;;  %vm617_vm1 = vcmask 1042434  }
  0xa5   : > { %928 = vmatprep.subr.mxu0 %v477_v1  ;;  %1001 = vmatprep.subr.mxu1 %v477_v1  ;;  %v474_v4 = vld [vmem:[#allocation11 + $0x60] sm:$0xff]  ;;  %v473_v5 = vld [vmem:[#allocation11 + $0x58] sm:$0xff]  ;;  %v472_v6 = vld [vmem:[#allocation11 + $0x50] sm:$0xff]  ;;  %vm619_vm2 = vcmask 1043459   ;;  %s1824_s7 = sld [smem:[#allocation20_spill]] }
  0xa6   : > { %929 = vmatpush3.msra.mxu0 %v477_v1  ;;  %1017 = vmatpush3.msra.mxu1 %v477_v1  ;;  %v471_v7 = vld [vmem:[#allocation11 + $0x48] sm:$0xff]  ;;  %v470_v8 = vld [vmem:[#allocation11 + $0x40] sm:$0xff]  ;;  %v469_v9 = vld [vmem:[#allocation11 + $0x38] sm:$0xff] }
  0xa7   : > { %930 = vmatprep.subr.mxu0 %v476_v2  ;;  %1002 = vmatprep.subr.mxu1 %v476_v2  ;;  %v468_v10 = vld [vmem:[#allocation11 + $0x30] sm:$0xff]  ;;  %v467_v11 = vld [vmem:[#allocation11 + $0x28] sm:$0xff]  ;;  %v466_v12 = vld [vmem:[#allocation11 + $0x20] sm:$0xff] }
  0xa8   : > { %931 = vmatpush3.msra.mxu0 %v476_v2  ;;  %1018 = vmatpush3.msra.mxu1 %v476_v2  ;;  %v465_v13 = vld [vmem:[#allocation11 + $0x18] sm:$0xff]  ;;  %v464_v14 = vld [vmem:[#allocation11 + $0x10] sm:$0xff]  ;;  %v463_v15 = vld [vmem:[#allocation11 + $0x8] sm:$0xff] }
  0xa9   : > { %932 = vmatprep.subr.mxu0 %v475_v3  ;;  %1003 = vmatprep.subr.mxu1 %v475_v3  ;;  %v438_v16 = vld [vmem:[%s1681_s28] sm:$0xff]  ;;  %v440_v18 = vld [vmem:[%s1681_s28 + $0x10] sm:$0xff]  ;;  %v439_v20 = vld [vmem:[%s1681_s28 + $0x8] sm:$0xff] }
  0xaa   : > { %933 = vmatpush3.msra.mxu0 %v475_v3  ;;  %1019 = vmatpush3.msra.mxu1 %v475_v3  ;;  %v442_v17 = vld [vmem:[%s1688_s21] sm:$0xff]  ;;  %v444_v19 = vld [vmem:[%s1688_s21 + $0x10] sm:$0xff]  ;;  %v443_v21 = vld [vmem:[%s1688_s21 + $0x8] sm:$0xff] }
  0xab   : > { %934 = vmatprep.subr.mxu0 %v474_v4  ;;  %1004 = vmatprep.subr.mxu1 %v474_v4  ;;  %v441_v22 = vld [vmem:[%s1681_s28 + $0x18] sm:$0xff]  ;;  %v462_v24 = vld [vmem:[#allocation11] sm:$0xff]  ;;  %v458_v25 = vsub.f32 %v438_v16, %v442_v17  ;;  %v460_v26 = vsub.f32 %v440_v18, %v444_v19  ;;  %v459_v27 = vsub.f32 %v439_v20, %v443_v21  ;;  %v447_v29 = vld [vmem:[%s1695_s2 + $0x8] sm:$0xff]  ;;  %p884_p9 = scmp.ne.s32.totalorder %s1824_s7, 1 }
  0xac   : > { %935 = vmatpush3.msra.mxu0 %v474_v4  ;;  %1020 = vmatpush3.msra.mxu1 %v474_v4  ;;  %v445_v23 = vld [vmem:[%s1688_s21 + $0x18] sm:$0xff]  ;;  %v446_v31 = vld [vmem:[%s1695_s2] sm:$0xff]  ;;  %v448_v32 = vld [vmem:[%s1695_s2 + $0x10] sm:$0xff]  ;;  %v451_v33 = vmax.f32 %v447_v29, 0.0  ;;  %s1825_s16 = sld [smem:[#allocation29_spill]] (!%p884_p9) }
  0xad   : > { %936 = vmatprep.subr.mxu0 %v473_v5  ;;  %1005 = vmatprep.subr.mxu1 %v473_v5  ;;  %v461_v28 = vsub.f32 %v441_v22, %v445_v23  ;;  %v449_v30 = vld [vmem:[%s1695_s2 + $0x18] sm:$0xff]  ;;  %v450_v35 = vmax.f32 %v446_v31, 0.0  ;;  %v452_v36 = vmax.f32 %v448_v32, 0.0 }
  0xae   : > { %937 = vmatpush3.msra.mxu0 %v473_v5  ;;  %1021 = vmatpush3.msra.mxu1 %v473_v5  ;;  %v453_v34 = vmax.f32 %v449_v30, 0.0  ;;  %v455_v37 = vmin.f32 %v451_v33, 1.0  ;;  %v883_v41 = vld [vmem:[%s1823_s20] ss:$0 sm:$0xff] }
  0xaf   : > { %938 = vmatprep.subr.mxu0 %v472_v6  ;;  %1006 = vmatprep.subr.mxu1 %v472_v6  ;;  %v454_v39 = vmin.f32 %v450_v35, 1.0  ;;  %v456_v40 = vmin.f32 %v452_v36, 1.0 }
  0xb0   : > { %939 = vmatpush3.msra.mxu0 %v472_v6  ;;  %1022 = vmatpush3.msra.mxu1 %v472_v6  ;;  %v457_v38 = vmin.f32 %v453_v34, 1.0  ;;  %v571_v42 = vsub.f32 1.0, %v455_v37  ;;  %v575_v44 = vmul.f32 %v455_v37, %v439_v20 }
  0xb1   : > { %940 = vmatprep.subr.mxu0 %v471_v7  ;;  %1007 = vmatprep.subr.mxu1 %v471_v7  ;;  %v570_v50 = vsub.f32 1.0, %v454_v39  ;;  %v572_v51 = vsub.f32 1.0, %v456_v40  ;;  %v574_v52 = vmul.f32 %v454_v39, %v438_v16  ;;  %v576_v53 = vmul.f32 %v456_v40, %v440_v18 }
  0xb2   : > { %941 = vmatpush3.msra.mxu0 %v471_v7  ;;  %1023 = vmatpush3.msra.mxu1 %v471_v7  ;;  %v573_v43 = vsub.f32 1.0, %v457_v38  ;;  %v577_v45 = vmul.f32 %v457_v38, %v441_v22 }
  0xb3   : > { %942 = vmatprep.subr.mxu0 %v470_v8  ;;  %1008 = vmatprep.subr.mxu1 %v470_v8 }
  0xb4   : > { %943 = vmatpush3.msra.mxu0 %v470_v8  ;;  %1024 = vmatpush3.msra.mxu1 %v470_v8 }
  0xb5   : > { %944 = vmatprep.subr.mxu0 %v469_v9  ;;  %1009 = vmatprep.subr.mxu1 %v469_v9 }
  0xb6   : > { %945 = vmatpush3.msra.mxu0 %v469_v9  ;;  %1025 = vmatpush3.msra.mxu1 %v469_v9 }
  0xb7   : > { %946 = vmatprep.subr.mxu0 %v468_v10  ;;  %1010 = vmatprep.subr.mxu1 %v468_v10 }
  0xb8   : > { %947 = vmatpush3.msra.mxu0 %v468_v10  ;;  %1026 = vmatpush3.msra.mxu1 %v468_v10 }
  0xb9   : > { %948 = vmatprep.subr.mxu0 %v467_v11  ;;  %1011 = vmatprep.subr.mxu1 %v467_v11 }
  0xba   : > { %949 = vmatpush3.msra.mxu0 %v467_v11  ;;  %1027 = vmatpush3.msra.mxu1 %v467_v11 }
  0xbb   : > { %950 = vmatprep.subr.mxu0 %v466_v12  ;;  %1012 = vmatprep.subr.mxu1 %v466_v12 }
  0xbc   : > { %951 = vmatpush3.msra.mxu0 %v466_v12  ;;  %1028 = vmatpush3.msra.mxu1 %v466_v12 }
  0xbd   : > { %952 = vmatprep.subr.mxu0 %v465_v13  ;;  %1013 = vmatprep.subr.mxu1 %v465_v13 }
  0xbe   : > { %953 = vmatpush3.msra.mxu0 %v465_v13  ;;  %1029 = vmatpush3.msra.mxu1 %v465_v13 }
  0xbf   : > { %954 = vmatprep.subr.mxu0 %v464_v14  ;;  %1014 = vmatprep.subr.mxu1 %v464_v14 }
  0xc0   : > { %955 = vmatpush3.msra.mxu0 %v464_v14  ;;  %1030 = vmatpush3.msra.mxu1 %v464_v14 }
  0xc1   : > { %956 = vmatprep.subr.mxu0 %v463_v15  ;;  %1015 = vmatprep.subr.mxu1 %v463_v15 }
  0xc2   : > { %957 = vmatpush3.msra.mxu0 %v463_v15  ;;  %1031 = vmatpush3.msra.mxu1 %v463_v15 }
  0xc3   : > { %958 = vmatprep.subr.mxu0 %v462_v24  ;;  %1016 = vmatprep.subr.mxu1 %v462_v24 }
  0xc4   : > { %959 = vmatpush3.msra.mxu0 %v462_v24  ;;  %1032 = vmatpush3.msra.mxu1 %v462_v24 }
  0xc5   : > { %960 = vmatprep.mubr.f32.mxu0 %v458_v25  ;;  %963 = vmatprep.mubr.f32.mxu1 %v460_v26 }
  0xc6   : > { %961 = vmatmul.mubr.f32.vlgmr.msra.gmra.mxu0 %v459_v27  ;;  %964 = vmatmul.mubr.f32.vlgmr.msra.gmra.mxu1 %v461_v28  ;;  %v586_v27 = vld [vmem:[#allocation2] sm:$0xf] }
 0x186   : > { %v962_v46 = vpop.f32.mrf.mxu0  ;;  %v965_v47 = vpop.f32.mrf.mxu1 }
 0x187   : > { %v557_v48 = vadd.f32 %v962_v46, %v883_v41  ;;  %v567_v49 = vadd.f32 %v965_v47, %v883_v41 }
 0x188   : > { %v551_v54 = vpop.f32.mrf.mxu0  ;;  %v561_v55 = vpop.f32.mrf.mxu1 }
 0x189   : > { %v579_v56 = vmul.f32 %v571_v42, %v557_v48  ;;  %v581_v57 = vmul.f32 %v573_v43, %v567_v49  ;;  %v552_v58 = vadd.f32 %v883_v41, %v551_v54  ;;  %v562_v59 = vadd.f32 %v883_v41, %v561_v55 }
 0x18b   : > { %v583_v60 = vadd.f32 %v579_v56, %v575_v44  ;;  %v585_v61 = vadd.f32 %v581_v57, %v577_v45  ;;  %v578_v62 = vmul.f32 %v570_v50, %v552_v58  ;;  %v580_v63 = vmul.f32 %v572_v51, %v562_v59 }
 0x18d   : > { %v593_v0 = vrot.slane %v583_v60, 4  ;;  %v605_v1 = vrot.slane %v585_v61, 4  ;;  %v582_v2 = vadd.f32 %v578_v62, %v574_v52  ;;  %v584_v3 = vadd.f32 %v580_v63, %v576_v53 }
 0x18f   : > { %v594_v4 = vadd.f32 %v593_v0, %v583_v60  ;;  %v606_v5 = vadd.f32 %v605_v1, %v585_v61  ;;  %v587_v6 = vrot.slane %v582_v2, 4  ;;  %v599_v7 = vrot.slane %v584_v3, 4 }
 0x191   : > { %v595_v8 = vrot.slane %v594_v4, 2  ;;  %v607_v9 = vrot.slane %v606_v5, 2  ;;  %v588_v10 = vadd.f32 %v587_v6, %v582_v2  ;;  %v600_v11 = vadd.f32 %v599_v7, %v584_v3 }
 0x193   : > { %v596_v12 = vadd.f32 %v595_v8, %v594_v4  ;;  %v608_v13 = vadd.f32 %v607_v9, %v606_v5  ;;  %v589_v14 = vrot.slane %v588_v10, 2  ;;  %v601_v15 = vrot.slane %v600_v11, 2 }
 0x195   : > { %v597_v16 = vrot.slane %v596_v12, 1  ;;  %v590_v17 = vadd.f32 %v589_v14, %v588_v10  ;;  %v602_v18 = vadd.f32 %v601_v15, %v600_v11  ;;  %v609_v19 = vrot.slane %v608_v13, 1 }
 0x197   : > { %v591_v20 = vrot.slane %v590_v17, 1  ;;  %v603_v21 = vrot.slane %v602_v18, 1  ;;  %v598_v22 = vadd.f32 %v597_v16, %v596_v12  ;;  %v610_v25 = vadd.f32 %v609_v19, %v608_v13 }
 0x199   : > { %v592_v23 = vadd.f32 %v591_v20, %v590_v17  ;;  %v604_v24 = vadd.f32 %v603_v21, %v602_v18 }
 0x19b   : > { %v616_v26 = vsel %vm615_vm0, %v598_v22, %v592_v23 }
 0x19c   : > { %v618_v28 = vsel %vm617_vm1, %v604_v24, %v616_v26  ;;  %627 = sbr.rel (%p884_p9) target bundleno = 646 (0x286), region = 76 }
 0x19d   : > { %v620_v29 = vsel %vm619_vm2, %v610_v25, %v618_v28 }
 0x19e   : > { %v622_v30 = vadd.f32 %v620_v29, %v586_v27 }
 0x1a0   : > { %623 = vst [vmem:[#allocation2] sm:$0xf] %v622_v30 }
 0x1a1   : > { %v645_v31 = vld [vmem:[#allocation13 + $0x78] sm:$0xff]  ;;  %v1417_v32 = vmov 0.0   ;;  %v644_v33 = vld [vmem:[#allocation13 + $0x70] sm:$0xff]  ;;  %vm1418_vm3 = vmmov 0   ;;  %v643_v34 = vld [vmem:[#allocation13 + $0x68] sm:$0xff] }
 0x1a2   : > { %966 = vmatprep.subr.mxu0 %v1417_v32  ;;  %998 = vmatprep.mubr.msk.f32.mxu0 %vm1418_vm3, %v1417_v32  ;;  %v642_v35 = vld [vmem:[#allocation13 + $0x60] sm:$0xff]  ;;  %v641_v36 = vld [vmem:[#allocation13 + $0x58] sm:$0xff]  ;;  %v640_v37 = vld [vmem:[#allocation13 + $0x50] sm:$0xff] }
 0x1a3   : > { %967 = vmatpush3.msra.mxu0 %v645_v31  ;;  %v639_v38 = vld [vmem:[#allocation13 + $0x48] sm:$0xff]  ;;  %v638_v39 = vld [vmem:[#allocation13 + $0x40] sm:$0xff]  ;;  %v637_v40 = vld [vmem:[#allocation13 + $0x38] sm:$0xff] }
 0x1a4   : > { %968 = vmatprep.subr.mxu0 %v1417_v32  ;;  %v636_v41 = vld [vmem:[#allocation13 + $0x30] sm:$0xff]  ;;  %v635_v42 = vld [vmem:[#allocation13 + $0x28] sm:$0xff]  ;;  %v634_v43 = vld [vmem:[#allocation13 + $0x20] sm:$0xff] }
 0x1a5   : > { %969 = vmatpush3.msra.mxu0 %v644_v33  ;;  %v633_v44 = vld [vmem:[#allocation13 + $0x18] sm:$0xff]  ;;  %v632_v45 = vld [vmem:[#allocation13 + $0x10] sm:$0xff]  ;;  %v631_v47 = vld [vmem:[#allocation13 + $0x8] sm:$0xff] }
 0x1a6   : > { %970 = vmatprep.subr.mxu0 %v1417_v32  ;;  %v630_v48 = vld [vmem:[#allocation13] sm:$0xff]  ;;  %v885_v50 = vld [vmem:[%s1825_s16] ss:$0 sm:$0xff] }
 0x1a7   : > { %971 = vmatpush3.msra.mxu0 %v643_v34  ;;  %v628_v46 = vld [vmem:[#allocation2] sm:$0xf] }
 0x1a8   : > { %972 = vmatprep.subr.mxu0 %v1417_v32  ;;  %v629_v49 = vmul.f32 0.0625, %v628_v46 }
 0x1a9   : > { %973 = vmatpush3.msra.mxu0 %v642_v35 }
 0x1aa   : > { %974 = vmatprep.subr.mxu0 %v1417_v32 }
 0x1ab   : > { %975 = vmatpush3.msra.mxu0 %v641_v36 }
 0x1ac   : > { %976 = vmatprep.subr.mxu0 %v1417_v32 }
 0x1ad   : > { %977 = vmatpush3.msra.mxu0 %v640_v37 }
 0x1ae   : > { %978 = vmatprep.subr.mxu0 %v1417_v32 }
 0x1af   : > { %979 = vmatpush3.msra.mxu0 %v639_v38 }
 0x1b0   : > { %980 = vmatprep.subr.mxu0 %v1417_v32 }
 0x1b1   : > { %981 = vmatpush3.msra.mxu0 %v638_v39 }
 0x1b2   : > { %982 = vmatprep.subr.mxu0 %v1417_v32 }
 0x1b3   : > { %983 = vmatpush3.msra.mxu0 %v637_v40 }
 0x1b4   : > { %984 = vmatprep.subr.mxu0 %v1417_v32 }
 0x1b5   : > { %985 = vmatpush3.msra.mxu0 %v636_v41 }
 0x1b6   : > { %986 = vmatprep.subr.mxu0 %v1417_v32 }
 0x1b7   : > { %987 = vmatpush3.msra.mxu0 %v635_v42 }
 0x1b8   : > { %988 = vmatprep.subr.mxu0 %v1417_v32 }
 0x1b9   : > { %989 = vmatpush3.msra.mxu0 %v634_v43 }
 0x1ba   : > { %990 = vmatprep.subr.mxu0 %v1417_v32 }
 0x1bb   : > { %991 = vmatpush3.msra.mxu0 %v633_v44 }
 0x1bc   : > { %992 = vmatprep.subr.mxu0 %v1417_v32 }
 0x1bd   : > { %993 = vmatpush3.msra.mxu0 %v632_v45 }
 0x1be   : > { %994 = vmatprep.subr.mxu0 %v1417_v32 }
 0x1bf   : > { %995 = vmatpush3.msra.mxu0 %v631_v47 }
 0x1c0   : > { %996 = vmatprep.subr.mxu0 %v1417_v32 }
 0x1c1   : > { %997 = vmatpush3.msra.mxu0 %v630_v48 }
 0x1c2   : > { %999 = vmatmul.mubr.f32.vlgmr.msra.gmra.mxu0 %v629_v49 }
 0x282   : > { %v719_v51 = vpop.f32.mrf.mxu0 }
 0x283   : > { %v720_v52 = vadd.f32 %v885_v50, %v719_v51 }
 0x284   : > { %v1000_v53 = vpop.f32.mrf.mxu0 }
 0x285   : > { %723 = vst [vmem:[#allocation14] sm:$0xf] %v720_v52 }
 0x286 PF: > { %p1073_p11 = scmp.eq.s32.totalorder %s1510_s15, 1  ;;  %s1419_s26 = smov [#allocation14]  }
 0x287   : > { %s733_s24 = sshll.u32 %s1419_s26, 4  ;;  %s734_s24 = int_to_ptr.vmem [resolvable:$true] %s733_s24 }
 0x288   : > { %s1292_s4 = scalar_lea.vmem %s734_s24, 64  ;;  %p1299_p6 = scmp.lt.s32.totalorder %s734_s24, %s734_s24 }
 0x289   : > { %p1293_p13 = scmp.ne.s32.totalorder %s734_s24, %s1292_s4  ;;  %p1300_p12 = scmp.lt.s32.totalorder %s1292_s4, %s1292_s4 }
 0x28b   : > { %p1294_p2 = pnand %p1293_p13, %p1073_p11  ;;  %p1301_p8 = por %p1300_p12, %p1299_p6 }
 0x28d   : > { %p1295_p0 = pneg %p1294_p2 }
 0x28f   : > { %p1302_p7 = pnand %p1301_p8, %p1295_p0 }
 0x291   : > { %1305 = shalt.err (!%p1302_p7)
}
 0x292   : > { %s1826_s14 = sld [smem:[#allocation30_spill]] }
 0x298   : > { %1048 = dma.vmem_to_hbm [thread:$0]  (%p1073_p11), %s734_s24, 64, %s1826_s14, [#allocation7]  }
 0x299   : > { %1369 = dma.done.wait (%p1073_p11), [#allocation7], 64  }
 0x29a   : > { %1371 = vsyncadd (%p1073_p11), [#allocation7], 4294967232 }
 0x29b PF: > { %s1827_s28 = sld [smem:[#allocation21_spill]]  ;;  %s1831_s29 = smov %s1378_s30 }
 0x29c   : > { %s1828_s23 = sld [smem:[#allocation25_spill]]  ;;  %s1832_s30 = smov %s1382_s9 }
 0x29d   : > { %s1829_s13 = sld [smem:[#allocation24_spill]]  ;;  %s1834_s10 = smov %s1390_s11 }
 0x29e   : > { %s1830_s21 = sld [smem:[#allocation23_spill]]  ;;  %s1835_s11 = smov %s1394_s12 }
 0x2a1   : > { %s27_s14 = sadd.s32 1, %s1827_s28  }
 0x2a2   : > { %p24_p4 = scmp.ge.s32.totalorder %s27_s14, 4   ;;  %s1833_s9 = smov %s1828_s23 }
 0x2a3   : > { %s1836_s12 = smov %s1829_s13  ;;  %s1837_s13 = smov %s1402_s0 }
 0x2a4   : > { %s1838_s0 = smov %s1830_s21  ;;  %26 = sbr.rel (!%p24_p4) target bundleno = 17 (0x11), region = 126 }
 0x2a9   :  { %746 = vsyncpa [#allocation6], 1 }
 0x2aa   :  { %748 = vsyncpa [#allocation6 + $0x1], 1 }
 0x2ab   :  { %749 = vsyncpa [#allocation9], 1 }
 0x2ac   :  { %751 = vsyncpa [#allocation9 + $0x1], 1 }
 0x2ad   :  { %752 = vsyncpa [#allocation12], 1 }
 0x2ae   :  { %753 = vsyncpa [#allocation7], 1 }
 0x2af   :  { %755 = vsyncpa [#allocation7 + $0x1], 1 }

</bundles_post_ra>
